<compile_context>
chip_gen: v5e
topology: v5e:2x2
jax: 0.10.0
libtpu: 0.0.40
codegen_flags: <defaults>
</compile_context>

<pallas_src>
import functools
import math

import jax
import jax.numpy as jnp
from jax.experimental import pallas as pl
from jax.experimental.pallas import tpu as pltpu


# --------------------------------------------------------------------------- #
# Shared helper: lane-parallel accumulation of a (tr, tl) f32 tile into a
# (tr, 128) f32 accumulator (VALU-only per step; one XLU reduce at finalize).
# --------------------------------------------------------------------------- #
def _accum_lane_groups(acc_ref, y_f32, lane_tile):
    if lane_tile >= 128 and lane_tile % 128 == 0:
        acc = acc_ref[...]
        for g in range(lane_tile // 128):                    # static, unrolled
            acc = acc + y_f32[:, g * 128:(g + 1) * 128]
        acc_ref[...] = acc
    else:
        # Degenerate small-L case (single tile, tl == L < 128): one XLU reduce.
        acc_ref[:, 0:1] = acc_ref[:, 0:1] + jnp.sum(y_f32, axis=-1, keepdims=True)


# --------------------------------------------------------------------------- #
# Fused kernel: one HBM sweep of Y per row block.
# --------------------------------------------------------------------------- #
def _ecam_fused_kernel(y_ref, band_ref, o_ref, acc_ref, *,
                       seq_len, lane_tile, n_lane_tiles):
    l = pl.program_id(1)
    last = pl.num_programs(1) - 1
    rem = seq_len % lane_tile                                # static python int

    @pl.when(l == 0)
    def _init():
        acc_ref[...] = jnp.zeros_like(acc_ref)

    y = y_ref[...]                                           # (tr, tl), Y dtype
    yf = y.astype(jnp.float32)

    # ---- accumulate row sums; mask only the partial last L tile ----
    if rem == 0:
        _accum_lane_groups(acc_ref, yf, lane_tile)
    else:
        @pl.when(l != last)
        def _full():
            _accum_lane_groups(acc_ref, yf, lane_tile)

        @pl.when(l == last)
        def _masked():
            col = jax.lax.broadcasted_iota(jnp.int32, yf.shape, 1)
            _accum_lane_groups(acc_ref, jnp.where(col < rem, yf, 0.0), lane_tile)

    # ---- stage the Y tile into the resident (tr, L) output block ----
    start = pl.multiple_of(l * lane_tile, lane_tile)
    if rem == 0:
        o_ref[:, pl.ds(start, lane_tile)] = y
    else:
        @pl.when(l != last)
        def _store_full():
            o_ref[:, pl.ds(start, lane_tile)] = y

        @pl.when(l == last)
        def _store_tail():
            o_ref[:, pl.ds(start, rem)] = y[:, :rem]

    # ---- finalize: banded conv + sigmoid, rescale the resident block ----
    @pl.when(l == last)
    def _finalize():
        # att = band @ gap; lane-reduce and band mixing commute (both linear),
        # so apply the band to the (tr, 128) accumulator then reduce lanes once.
        att = jnp.dot(band_ref[...], acc_ref[...],
                      preferred_element_type=jnp.float32)     # (tr, 128)
        att = jnp.sum(att, axis=-1, keepdims=True) * (1.0 / seq_len)  # (tr, 1)
        scale = 1.0 + jax.nn.sigmoid(att)                     # residual folded in, f32
        for c in range(n_lane_tiles):                         # static, chunked rescale
            c0 = c * lane_tile
            size = min(lane_tile, seq_len - c0)
            blk = o_ref[:, c0:c0 + size].astype(jnp.float32)
            o_ref[:, c0:c0 + size] = (blk * scale).astype(o_ref.dtype)


def _make_band(w, C, tr, k):
    """(tr, tr) banded conv matrix (att = band @ gap); zero padding at every
    C-row batch span so the conv never mixes channels across batches."""
    pad = k // 2
    r = jnp.arange(tr, dtype=jnp.int32)[:, None]
    s = jnp.arange(tr, dtype=jnp.int32)[None, :]
    same_span = (r // C) == (s // C)
    band = jnp.zeros((tr, tr), jnp.float32)
    for j in range(k):                                        # k is 3..7, unrolled
        band = band + jnp.where(jnp.logical_and(s - r == j - pad, same_span),
                                w[j].astype(jnp.float32), 0.0)
    return band


# --------------------------------------------------------------------------- #
# Two-pass fallback kernels (only used when a (tr, L) row block can't fit VMEM).
# --------------------------------------------------------------------------- #
def _gap_kernel(y_ref, gap_ref, acc_ref, *, seq_len, lane_tile):
    l = pl.program_id(1)
    last = pl.num_programs(1) - 1
    rem = seq_len % lane_tile

    @pl.when(l == 0)
    def _init():
        acc_ref[...] = jnp.zeros_like(acc_ref)

    yf = y_ref[...].astype(jnp.float32)
    if rem == 0:
        _accum_lane_groups(acc_ref, yf, lane_tile)
    else:
        @pl.when(l != last)
        def _full():
            _accum_lane_groups(acc_ref, yf, lane_tile)

        @pl.when(l == last)
        def _masked():
            col = jax.lax.broadcasted_iota(jnp.int32, yf.shape, 1)
            _accum_lane_groups(acc_ref, jnp.where(col < rem, yf, 0.0), lane_tile)

    @pl.when(l == last)
    def _finalize():
        gap_ref[...] = jnp.sum(acc_ref[...], axis=-1, keepdims=True) * (1.0 / seq_len)


def _scale_kernel(y_ref, s_ref, o_ref):
    """out = Y * (1 + sigmoid(att)); the factor arrives precomputed in f32."""
    yf = y_ref[...].astype(jnp.float32)
    o_ref[...] = (yf * s_ref[...]).astype(o_ref.dtype)        # multiply in f32


# --------------------------------------------------------------------------- #
# Wrapper
# --------------------------------------------------------------------------- #
def ecam_pallas(Y, w, *, row_tile=256, lane_tile=4096,
                vmem_limit_bytes=48 * 1024 * 1024, force_two_pass=False):
    """ECAM forward: sigmoid(conv1d_C(mean_L(Y))) * Y + Y."""
    B, C, L = Y.shape
    k = int(w.shape[0])
    BC = B * C
    dsize = jnp.dtype(Y.dtype).itemsize
    Y2 = Y.reshape(BC, L)                                     # contiguous, free reshape

    # Lane tile: full L when it fits, else a multiple of 128.
    tl = L if L <= lane_tile else max(128, (lane_tile // 128) * 128)
    grid_l = pl.cdiv(L, tl)

    # ---- fused-path row tile: multiple of lcm(C, 8) (or all rows), VMEM-budgeted. ----
    unit = min(BC, (C * 8) // math.gcd(C, 8))
    budget = int(0.85 * vmem_limit_bytes)
    per_row = (2 * tl + 2 * L) * dsize + 128 * 4              # dbl-buf in/out + f32 acc
    tr_f = min(BC, max(row_tile, unit), max(budget // per_row, 0))
    tr_f = (tr_f // unit) * unit
    while tr_f >= unit and tr_f * per_row + 2 * tr_f * tr_f * 4 > budget:
        tr_f -= unit

    if not force_two_pass and tr_f >= unit:
        tr = tr_f
        band = _make_band(w, C, tr, k)
        out = pl.pallas_call(
            functools.partial(_ecam_fused_kernel, seq_len=L, lane_tile=tl,
                              n_lane_tiles=grid_l),
            out_shape=jax.ShapeDtypeStruct((BC, L), Y.dtype),
            grid=(pl.cdiv(BC, tr), grid_l),
            in_specs=[pl.BlockSpec((tr, tl), lambda i, l: (i, l)),
                      pl.BlockSpec((tr, tr), lambda i, l: (0, 0))],   # band, resident
            out_specs=pl.BlockSpec((tr, L), lambda i, l: (i, 0)),     # resident over L
            scratch_shapes=[pltpu.VMEM((tr, 128), jnp.float32)],
            compiler_params=pltpu.CompilerParams(
                dimension_semantics=("parallel", "arbitrary"),
                vmem_limit_bytes=vmem_limit_bytes),
        )(Y2, band)
        return out.reshape(B, C, L)

    # ---- fallback: two HBM sweeps; conv + sigmoid on the pooled vector is glue. ----
    tr = min(BC, max(8, (row_tile // 8) * 8))
    grid_r = pl.cdiv(BC, tr)

    gap = pl.pallas_call(
        functools.partial(_gap_kernel, seq_len=L, lane_tile=tl),
        out_shape=jax.ShapeDtypeStruct((BC, 1), jnp.float32),
        grid=(grid_r, grid_l),
        in_specs=[pl.BlockSpec((tr, tl), lambda i, l: (i, l))],
        out_specs=pl.BlockSpec((tr, 1), lambda i, l: (i, 0)),
        scratch_shapes=[pltpu.VMEM((tr, 128), jnp.float32)],
        compiler_params=pltpu.CompilerParams(
            dimension_semantics=("parallel", "arbitrary"),
            vmem_limit_bytes=vmem_limit_bytes),
    )(Y2)

    pad = k // 2
    gp = jnp.pad(gap.reshape(B, C), ((0, 0), (pad, pad)))     # zero 'same' padding along C
    att = jnp.zeros((B, C), jnp.float32)
    for j in range(k):                                        # k is 3..7, unrolled
        att = att + w[j].astype(jnp.float32) * gp[:, j:j + C]
    scale = (1.0 + jax.nn.sigmoid(att)).reshape(BC, 1)        # residual folded in, f32

    out = pl.pallas_call(
        _scale_kernel,
        out_shape=jax.ShapeDtypeStruct((BC, L), Y.dtype),
        grid=(grid_r, grid_l),
        in_specs=[pl.BlockSpec((tr, tl), lambda i, l: (i, l)),
                  pl.BlockSpec((tr, 1), lambda i, l: (i, 0))],
        out_specs=pl.BlockSpec((tr, tl), lambda i, l: (i, l)),
        compiler_params=pltpu.CompilerParams(
            dimension_semantics=("parallel", "parallel"),
            vmem_limit_bytes=vmem_limit_bytes),
    )(Y2, scale)
    return out.reshape(B, C, L)


# --------------------------------------------------------------------------- #
# Params + pure-JAX reference
# --------------------------------------------------------------------------- #
def make_ecam_params(in_channel, b=1, gama=2, seed=0):
    """Deterministic synthetic Conv1d(1,1,k,bias=False) weight with ECAM's k rule."""
    k = int(abs((math.log(in_channel, 2) + b) / gama))
    if not (k % 2):
        k = k + 1
    bound = 1.0 / math.sqrt(k)                                # ~ PyTorch Conv1d init
    w = jax.random.uniform(jax.random.PRNGKey(seed), (k,), jnp.float32,
                           minval=-bound, maxval=bound)
    return w, k


def ecam_reference(Y, w, k):
    """Pure-JAX reference mirroring the PyTorch forward."""
    B, C, L = Y.shape
    gap = jnp.mean(Y.astype(jnp.float32), axis=-1)            # (B, C)
    pad = k // 2
    gp = jnp.pad(gap, ((0, 0), (pad, pad)))
    att = jnp.zeros((B, C), jnp.float32)
    for j in range(k):
        att = att + w[j] * gp[:, j:j + C]
    att = jax.nn.sigmoid(att)[..., None]                      # (B, C, 1)
    out = att * Y.astype(jnp.float32) + Y.astype(jnp.float32)
    return out.astype(Y.dtype)


if __name__ == "__main__":
    B, C, L = 2, 8, 192                                       # in_channel=8 -> kernel_size=3
    Y = jax.random.normal(jax.random.PRNGKey(0), (B, C, L), jnp.float32)
    w, k = make_ecam_params(C, b=1, gama=2, seed=0)
    ref = ecam_reference(Y, w, k)

    # Fused single-HBM-sweep path; tiny tiles so the toy shape still exercises
    # multi row-block, multi L-tile, and partial-last-tile code paths.
    fused = jax.jit(functools.partial(ecam_pallas, row_tile=8, lane_tile=128))
    out_fused = jax.block_until_ready(fused(Y, w))
    assert out_fused.shape == (B, C, L)
    assert float(jnp.max(jnp.abs(out_fused - ref))) < 1e-4, "fused mismatch vs reference"

    # Two-pass fallback path (used when a full (tr, L) row block can't fit VMEM).
    two_pass = jax.jit(functools.partial(ecam_pallas, row_tile=8, lane_tile=128,
                                         force_two_pass=True))
    out_two = jax.block_until_ready(two_pass(Y, w))
    assert float(jnp.max(jnp.abs(out_two - ref))) < 1e-4, "two-pass mismatch vs reference"

    print("KERNEL_OK")
</pallas_src>

<mosaic_0001>
module attributes {stable_mosaic.version = 11 : i64} {
  func.func @_ecam_fused_kernel(%arg0: i32, %arg1: i32, %arg2: memref<8x128xf32, #tpu.memory_space<vmem>>, %arg3: memref<8x8xf32, #tpu.memory_space<vmem>>, %arg4: memref<8x192xf32, #tpu.memory_space<vmem>>, %arg5: memref<8x128xf32, #tpu.memory_space<vmem>>) attributes {dimension_semantics = [#tpu.dimension_semantics<parallel>, #tpu.dimension_semantics<arbitrary>], iteration_bounds = array<i64: 2, 2>, scalar_prefetch = 0 : i64, scratch_operands = 1 : i64, tpu.core_type = #tpu.core_type<tc>, window_params = [{transform_indices = @transform_0, window_bounds = array<i64: 8, 128>}, {pipeline_mode = #tpu.pipeline_mode<synchronous>, transform_indices = @transform_1, window_bounds = array<i64: 8, 8>}, {transform_indices = @transform_2, window_bounds = array<i64: 8, 192>}]} {
    %c0_i32 = arith.constant 0 : i32
    %0 = arith.cmpi eq, %arg1, %c0_i32 : i32
    %1 = arith.extui %0 : i1 to i32
    %c0_i32_0 = arith.constant 0 : i32
    %2 = arith.cmpi ne, %1, %c0_i32_0 : i32
    scf.if %2 {
      %cst = arith.constant 0.000000e+00 : f32
      %21 = vector.broadcast %cst : f32 to vector<8x128xf32>
      %c0_11 = arith.constant 0 : index
      %c0_12 = arith.constant 0 : index
      %22 = vector.load %arg5[%c0_11, %c0_12] : memref<8x128xf32, #tpu.memory_space<vmem>>, vector<8x128xf32>
      tpu.vector_store %arg5[%c0_11, %c0_12], %21 {strides = array<i32>} : memref<8x128xf32, #tpu.memory_space<vmem>>, vector<8x128xf32>,
    } else {
    }
    %c0 = arith.constant 0 : index
    %c0_1 = arith.constant 0 : index
    %3 = vector.load %arg2[%c0, %c0_1] : memref<8x128xf32, #tpu.memory_space<vmem>>, vector<8x128xf32>
    %c1_i32 = arith.constant 1 : i32
    %4 = arith.cmpi ne, %arg1, %c1_i32 : i32
    %5 = arith.extui %4 : i1 to i32
    %c0_i32_2 = arith.constant 0 : i32
    %6 = arith.cmpi ne, %5, %c0_i32_2 : i32
    scf.if %6 {
      %c0_11 = arith.constant 0 : index
      %c0_12 = arith.constant 0 : index
      %21 = vector.load %arg5[%c0_11, %c0_12] : memref<8x128xf32, #tpu.memory_space<vmem>>, vector<8x128xf32>
      %22 = arith.addf %21, %3 : vector<8x128xf32>
      %c0_13 = arith.constant 0 : index
      %c0_14 = arith.constant 0 : index
      %23 = vector.load %arg5[%c0_13, %c0_14] : memref<8x128xf32, #tpu.memory_space<vmem>>, vector<8x128xf32>
      tpu.vector_store %arg5[%c0_13, %c0_14], %22 {strides = array<i32>} : memref<8x128xf32, #tpu.memory_space<vmem>>, vector<8x128xf32>,
    } else {
    }
    %c1_i32_3 = arith.constant 1 : i32
    %7 = arith.cmpi eq, %arg1, %c1_i32_3 : i32
    %8 = arith.extui %7 : i1 to i32
    %c0_i32_4 = arith.constant 0 : i32
    %9 = arith.cmpi ne, %8, %c0_i32_4 : i32
    scf.if %9 {
      %21 = tpu.iota {dimensions = array<i32: 1>} : vector<8x128xi32>
      %c64_i32 = arith.constant 64 : i32
      %22 = vector.broadcast %c64_i32 : i32 to vector<8x128xi32>
      %23 = arith.cmpi slt, %21, %22 : vector<8x128xi32>
      %cst = arith.constant 0.000000e+00 : f32
      %24 = vector.broadcast %cst : f32 to vector<8x128xf32>
      %25 = arith.select %23, %3, %24 : vector<8x128xi1>, vector<8x128xf32>
      %c0_11 = arith.constant 0 : index
      %c0_12 = arith.constant 0 : index
      %26 = vector.load %arg5[%c0_11, %c0_12] : memref<8x128xf32, #tpu.memory_space<vmem>>, vector<8x128xf32>
      %27 = arith.addf %26, %25 : vector<8x128xf32>
      %c0_13 = arith.constant 0 : index
      %c0_14 = arith.constant 0 : index
      %28 = vector.load %arg5[%c0_13, %c0_14] : memref<8x128xf32, #tpu.memory_space<vmem>>, vector<8x128xf32>
      tpu.vector_store %arg5[%c0_13, %c0_14], %27 {strides = array<i32>} : memref<8x128xf32, #tpu.memory_space<vmem>>, vector<8x128xf32>,
    } else {
    }
    %c128_i32 = arith.constant 128 : i32
    %10 = arith.muli %arg1, %c128_i32 : i32
    %11 = tpu.assume_multiple %10, 128 : i32
    %c1_i32_5 = arith.constant 1 : i32
    %12 = arith.cmpi ne, %arg1, %c1_i32_5 : i32
    %13 = arith.extui %12 : i1 to i32
    %c0_i32_6 = arith.constant 0 : i32
    %14 = arith.cmpi ne, %13, %c0_i32_6 : i32
    scf.if %14 {
      %c0_11 = arith.constant 0 : index
      %21 = arith.index_cast %11 : i32 to index
      %22 = vector.load %arg4[%c0_11, %21] : memref<8x192xf32, #tpu.memory_space<vmem>>, vector<8x128xf32>
      tpu.vector_store %arg4[%c0_11, %21], %3 {strides = array<i32>} : memref<8x192xf32, #tpu.memory_space<vmem>>, vector<8x128xf32>,
    } else {
    }
    %c1_i32_7 = arith.constant 1 : i32
    %15 = arith.cmpi eq, %arg1, %c1_i32_7 : i32
    %16 = arith.extui %15 : i1 to i32
    %c0_i32_8 = arith.constant 0 : i32
    %17 = arith.cmpi ne, %16, %c0_i32_8 : i32
    scf.if %17 {
      %21 = vector.extract_strided_slice %3 {offsets = [0, 0], sizes = [8, 64], strides = [1, 1]} : vector<8x128xf32> to vector<8x64xf32>
      %c0_11 = arith.constant 0 : index
      %22 = arith.index_cast %11 : i32 to index
      %23 = vector.load %arg4[%c0_11, %22] : memref<8x192xf32, #tpu.memory_space<vmem>>, vector<8x64xf32>
      tpu.vector_store %arg4[%c0_11, %22], %21 {strides = array<i32>} : memref<8x192xf32, #tpu.memory_space<vmem>>, vector<8x64xf32>,
    } else {
    }
    %c1_i32_9 = arith.constant 1 : i32
    %18 = arith.cmpi eq, %arg1, %c1_i32_9 : i32
    %19 = arith.extui %18 : i1 to i32
    %c0_i32_10 = arith.constant 0 : i32
    %20 = arith.cmpi ne, %19, %c0_i32_10 : i32
    scf.if %20 {
      %c0_11 = arith.constant 0 : index
      %c0_12 = arith.constant 0 : index
      %21 = vector.load %arg3[%c0_11, %c0_12] : memref<8x8xf32, #tpu.memory_space<vmem>>, vector<8x8xf32>
      %c0_13 = arith.constant 0 : index
      %c0_14 = arith.constant 0 : index
      %22 = vector.load %arg5[%c0_13, %c0_14] : memref<8x128xf32, #tpu.memory_space<vmem>>, vector<8x128xf32>
      %cst = arith.constant dense<0.000000e+00> : vector<8x128xf32>
      %23 = tpu.matmul %21, %22, %cst {dimension_numbers = #tpu.dot_dimension_numbers<[1], [0], [0], [1], [0, 0, 1, 1], [], []>} : vector<8x8xf32>, vector<8x128xf32>, vector<8x128xf32> -> vector<8x128xf32>
      %cst_15 = arith.constant dense<0.000000e+00> : vector<8xf32>
      %24 = vector.multi_reduction <add>, %23, %cst_15 [1] : vector<8x128xf32> to vector<8xf32>
      %25 = vector.shape_cast %24 : vector<8xf32> to vector<8x1xf32>
      %cst_16 = arith.constant 0.00520833349 : f32
      %26 = vector.broadcast %cst_16 : f32 to vector<8x1xf32>
      %27 = arith.mulf %25, %26 : vector<8x1xf32>
      %28 = arith.negf %27 : vector<8x1xf32>
      %29 = math.exp %28 : vector<8x1xf32>
      %cst_17 = arith.constant 1.000000e+00 : f32
      %30 = vector.broadcast %cst_17 : f32 to vector<8x1xf32>
      %31 = arith.addf %30, %29 : vector<8x1xf32>
      %32 = arith.divf %30, %31 : vector<8x1xf32>
      %cst_18 = arith.constant 1.000000e+00 : f32
      %33 = vector.broadcast %cst_18 : f32 to vector<8x1xf32>
      %34 = arith.addf %33, %32 : vector<8x1xf32>
      %c0_19 = arith.constant 0 : index
      %c0_20 = arith.constant 0 : index
      %35 = vector.load %arg4[%c0_19, %c0_20] : memref<8x192xf32, #tpu.memory_space<vmem>>, vector<8x128xf32>
      %36 = vector.broadcast %34 : vector<8x1xf32> to vector<8x128xf32>
      %37 = arith.mulf %35, %36 : vector<8x128xf32>
      %c0_21 = arith.constant 0 : index
      %c0_22 = arith.constant 0 : index
      %38 = vector.load %arg4[%c0_21, %c0_22] : memref<8x192xf32, #tpu.memory_space<vmem>>, vector<8x128xf32>
      tpu.vector_store %arg4[%c0_21, %c0_22], %37 {strides = array<i32>} : memref<8x192xf32, #tpu.memory_space<vmem>>, vector<8x128xf32>,
      %c0_23 = arith.constant 0 : index
      %c128 = arith.constant 128 : index
      %39 = vector.load %arg4[%c0_23, %c128] : memref<8x192xf32, #tpu.memory_space<vmem>>, vector<8x64xf32>
      %40 = vector.broadcast %34 : vector<8x1xf32> to vector<8x64xf32>
      %41 = arith.mulf %39, %40 : vector<8x64xf32>
      %c0_24 = arith.constant 0 : index
      %c128_25 = arith.constant 128 : index
      %42 = vector.load %arg4[%c0_24, %c128_25] : memref<8x192xf32, #tpu.memory_space<vmem>>, vector<8x64xf32>
      tpu.vector_store %arg4[%c0_24, %c128_25], %41 {strides = array<i32>} : memref<8x192xf32, #tpu.memory_space<vmem>>, vector<8x64xf32>,
    } else {
    }
    return
  }
  func.func @transform_0(%arg0: i32, %arg1: i32) -> (i32, i32) {
    %c0_i32 = arith.constant 0 : i32
    return %arg0, %arg1 : i32, i32
  }
  func.func @transform_1(%arg0: i32, %arg1: i32) -> (i32, i32) {
    %c0_i32 = arith.constant 0 : i32
    %c0_i32_0 = arith.constant 0 : i32
    %c0_i32_1 = arith.constant 0 : i32
    return %c0_i32, %c0_i32_0 : i32, i32
  }
  func.func @transform_2(%arg0: i32, %arg1: i32) -> (i32, i32) {
    %c0_i32 = arith.constant 0 : i32
    %c0_i32_0 = arith.constant 0 : i32
    return %arg0, %c0_i32 : i32, i32
  }
}

</mosaic_0001>

<bundles_post_ra>
// kernel: ecam_pallas.1
= control target key start
LH: loop header
LB: loop body
LE: loop exit
PB: predicated region body
PF: predicated region fallthrough
CT: control target
= control target key end

     0   :  { %7 = vsyncpa [#allocation4], 0  ;;  %s877_s0 = inlined_call_operand.hbm [shape: f32[16,192], index: 0, kind: input, shape index: {}]   ;;  %s878_s1 = inlined_call_operand.vmem [shape: f32[8,8], index: 1, kind: input, shape index: {}]   ;;  %s879_s2 = inlined_call_operand.hbm [shape: f32[16,192], index: 2, kind: output, shape index: {}]  }
   0x1   :  { %9 = vsyncpa [#allocation4 + $0x1], 0 }
   0x2   :  { %10 = vsyncpa [#allocation5], 0 }
   0x3   :  { %12 = vsyncpa [#allocation5 + $0x1], 0  ;;  %s681_s9 = smov 0   ;;  %s683_s10 = smov 0  }
   0x4   :  { %s685_s11 = smov 0   ;;  %s687_s12 = smov 0  }
   0x5   :  { %s689_s13 = smov 0   ;;  %s691_s14 = smov 0  }
   0x6   :  { %s693_s15 = smov 0   ;;  %s695_s16 = smov 0  }
   0x7   :  { %s697_s17 = smov 0   ;;  %s699_s18 = smov 0  }
   0x8   :  { %s701_s19 = smov 0  }
   0x9 LB: > { %s378_s20 = sadd.s32 4294967295, %s663_s19   ;;  %s379_s21 = sadd.s32 4294967294, %s663_s19   ;;  %s663_s19 = sphi %s701_s19, %s18_s19   ;;  %s659_s18 = sphi %s699_s18, %s899_s18   ;;  %s655_s17 = sphi %s697_s17, %s898_s17   ;;  %s651_s16 = sphi %s695_s16, %s897_s16   ;;  %s647_s15 = sphi %s693_s15, %s896_s15   ;;  %s643_s14 = sphi %s691_s14, %s895_s14   ;;  %s639_s13 = sphi %s689_s13, %s894_s13   ;;  %s635_s12 = sphi %s687_s12, %s893_s12   ;;  %s631_s11 = sphi %s685_s11, %s892_s11   ;;  %s627_s10 = sphi %s683_s10, %s891_s10   ;;  %s623_s9 = sphi %s681_s9, %s890_s9  }
   0xa   : > { %s27_s22 = sadd.s32 1, %s655_s17  ;;  %s30_s23 = sadd.s32 1, %s659_s18 }
   0xb   : > { %p28_p0 = scmp.ge.s32.totalorder %s27_s22, 2  ;;  %s39_s24 = sadd.s32 1, %s643_s14 }
   0xc   : > { %p46_p1 = scmp.ne.s32.totalorder %s643_s14, %s639_s13  ;;  %p47_p2 = scmp.eq.s32.totalorder %s663_s19, 0 }
   0xd   : > { %s901_s22 = smov (%p28_p0, %s27_s22), 0  ;;  %s903_s23 = smov (!%p28_p0, %s30_s23), %s659_s18 }
   0xe   : > { %882 = sst [smem:[#allocation9_spill]] %s901_s22  ;;  %s35_s25 = ssub.s32 %s655_s17, %s901_s22 }
   0xf   : > { %p747_p3 = por %p47_p2, %p46_p1  ;;  %p32_p4 = scmp.ge.s32.totalorder %s903_s23, 2 }
  0x10   : > { %p52_p5 = scmp.ne.s32.totalorder %s639_s13, %s635_s12  ;;  %p53_p6 = scmp.eq.s32.totalorder %s378_s20, 0 }
  0x11   : > { %s86_s27 = sadd.s32 1, %s631_s11  ;;  %s905_s23 = smov (%p32_p4, %s903_s23), 0 }
  0x12   : > { %884 = sst [smem:[#allocation10_spill]] %s905_s23  ;;  %p755_p7 = por %p53_p6, %p52_p5 }
  0x13   : > { %p96_p8 = scmp.ne.s32.totalorder %s631_s11, %s627_s10  ;;  %s34_s29 = ssub.s32 %s659_s18, %s905_s23 }
  0x14   : > { %p97_p9 = scmp.eq.s32.totalorder %s378_s20, 3  ;;  %s36_s30 = sor.u32 %s35_s25, %s34_s29 }
  0x15   : > { %p84_p10 = scmp.eq.s32.totalorder %s34_s29, 0  ;;  %p37_p11 = scmp.eq.s32.totalorder %s36_s30, 0 }
  0x16   : > { %p763_p12 = por %p97_p9, %p96_p8  ;;  %p102_p13 = scmp.ne.s32.totalorder %s627_s10, %s623_s9 }
  0x17   : > { %s768_s4 = scalar_select %p84_p10, %s631_s11, %s86_s27  }
  0x18   : > { %s771_s5 = scalar_select %p37_p11, %s643_s14, %s39_s24  }
  0x19   : > { %p103_p0 = scmp.eq.s32.totalorder %s379_s21, 3  ;;  %p416_p1 = scmp.lt.s32.totalorder %s663_s19, 4 }
  0x1a   : > { %s126_s7 = sand.u32 1, %s643_s14   ;;  %s383_s12 = sshll.u32 %s659_s18, 1 }
  0x1b   : > { %p776_p2 = por %p103_p0, %p102_p13  ;;  %s382_s8 = sshll.u32 %s126_s7, 3 }
  0x1c   : > { %s134_s20 = sadd.s32 %s655_s17, %s383_s12  ;;  %s130_s25 = scalar_lea.vmem [#allocation3], %s382_s8 }
  0x1d   : > { %s140_s29 = sshll.u32 %s130_s25, 4  ;;  %s384_s30 = sshll.u32 %s134_s20, 3  ;;  %s141_s29 = int_to_ptr.vmem [resolvable:$true] %s140_s29 }
  0x1e   : > { %s136_s23 = scalar_lea.hbm %s877_s0, %s384_s30  ;;  %p409_p4 = pnand %p416_p1, %p747_p3 }
  0x1f   : > { %s138_s21 = sshll.u32 %s136_s23, 4  ;;  %p385_p5 = scmp.ge.s32.totalorder %s663_s19, 1  ;;  %s139_s21 = int_to_ptr.hbm [resolvable:$true] %s138_s21 }
  0x20   : > { %s127_s22 = scalar_lea.sflag [#allocation4], %s126_s7  ;;  %p145_p6 = scmp.lt.s32.totalorder %s663_s19, 5 }
  0x21   : > { %411 = dma.hbm_to_vmem [thread:$0]  (!%p409_p4), %s139_s21, 128, %s141_s29, %s127_s22  }
  0x22   : > { %p146_p8 = pnand %p385_p5, %p145_p6 }
  0x23   : > { %s151_s8 = sand.u32 (!%p146_p8), 1, %s639_s13  }
  0x24   : > { %149 = sbr.rel (%p146_p8) target bundleno = 384 (0x180), region = 28  ;;  %s386_s12 = sshll.u32 (!%p146_p8), %s151_s8, 3 }
  0x25   : > { %s152_s20 = scalar_lea.sflag (!%p146_p8), [#allocation4], %s151_s8  ;;  %s155_s25 = scalar_lea.vmem (!%p146_p8), [#allocation3], %s386_s12 }
  0x29   : > { %614 = dma.done.wait (%p755_p7), %s152_s20, 128  }
  0x2a   : > { %616 = vsyncadd (%p755_p7), %s152_s20, 4294967168  ;;  %s174_s23 = sand.u32 1, %s627_s10   ;;  %p388_p3 = scmp.ne.s32.totalorder %s647_s15, 0 }
  0x2b   : > { %s387_s26 = sshll.u32 %s174_s23, 4 }
  0x2c   : > { %s798_s22 = scalar_lea.vmem [#allocation6], %s387_s26  ;;  %180 = sbr.rel (%p388_p3) target bundleno = 51 (0x33), region = 36 }
  0x31   : > { %v665_v0 = vmov 0.0  }
  0x32   : > { %181 = vst [vmem:[#allocation2] sm:$0xff] %v665_v0 }
  0x33 PF: > { %v182_v1 = vld [vmem:[%s155_s25] sm:$0xff]  ;;  %p389_p9 = scmp.eq.s32.totalorder %s647_s15, 1 }
  0x35   : > { %186 = sbr.rel (%p389_p9) target bundleno = 62 (0x3e), region = 40 }
  0x3a   : > { %v187_v2 = vld [vmem:[#allocation2] sm:$0xff] }
  0x3b   : > { %v188_v3 = vadd.f32 %v187_v2, %v182_v1 }
  0x3d   : > { %189 = vst [vmem:[#allocation2] sm:$0xff] %v188_v3 }
  0x3e PF: > { %p390_p7 = scmp.ne.s32.totalorder %s647_s15, 1 }
  0x40   : > { %193 = sbr.rel (%p390_p7) target bundleno = 78 (0x4e), region = 44 }
  0x45   : > { %v194_v4 = vlaneseq  ;;  %v198_v6 = vld [vmem:[#allocation2] sm:$0xff] }
  0x47   : > { %v195_v5 = vand.u32 127, %v194_v4 }
  0x49   : > { %vm196_vm0 = vcmp.lt.s32.totalorder %v195_v5, 64 }
  0x4a   : > { %v197_v7 = vsel %vm196_vm0, %v182_v1, 0.0 }
  0x4b   : > { %v199_v8 = vadd.f32 %v198_v6, %v197_v7 }
  0x4d   : > { %200 = vst [vmem:[#allocation2] sm:$0xff] %v199_v8 }
  0x4e PF: > { %s391_s28 = sshll.u32 %s647_s15, 7  ;;  %204 = sbr.rel (%p389_p9) target bundleno = 84 (0x54), region = 48 }
  0x4f   : > { %s205_s7 = sshra.s32 (!%p389_p9), %s391_s28, 7 }
  0x50   : > { %s393_s29 = sshll.u32 (!%p389_p9), %s205_s7, 3 }
  0x51   : > { %s208_s30 = scalar_lea.vmem (!%p389_p9), %s798_s22, %s393_s29 [#allocation6] }
  0x53   : > { %209 = vst [vmem:[%s208_s30] sm:$0xff] %v182_v1 }
  0x54 PF: > { %212 = sbr.rel (%p390_p7) target bundleno = 369 (0x171), region = 52  ;;  %s213_s21 = sshra.s32 (!%p390_p7), %s391_s28, 7 }
  0x55   : > { %s395_s8 = sshll.u32 (!%p390_p7), %s213_s21, 3 }
  0x56   : > { %s216_s12 = scalar_lea.vmem (!%p390_p7), %s798_s22, %s395_s8 [#allocation6] }
  0x59   : > { %v220_v9 = vld [vmem:[#allocation2] sm:$0xff]  ;;  %vm221_vm1 = vcmask 64512   ;;  %vm217_vm2 = vcmask 523264  }
  0x5a   : > { %v219_v10 = vld [vmem:[%s878_s1] sm:$0xff]  ;;  %240 = vmatpush.msra.mxu0 %v220_v9  ;;  %218 = vst.msk [vmem:[%s216_s12] sm:$0xff] %vm217_vm2, %v182_v1 }
  0x5b   : > { %396 = vmatmul.msk.f32.vlgmr.msra.gmra.mxu0 %vm221_vm1, %v219_v10 }
  0x61   : > { %v268_v27 = vld [vmem:[%s798_s22] sm:$0xff]  ;;  %v271_v28 = vld [vmem:[%s798_s22 + $0x8] sm:$0xff] }
  0xd8   : > { %v242_v11 = vpop.f32.mrf.mxu0 }
  0xd9   : > { %245 = vadd.xlane.f32.xlu0 %v242_v11 }
 0x14c   : > { %v246_v12 = vpop.xlane.xlu0 %245 }
 0x14d   : > { %v397_v13 = vmul.f32 -0.0052083335, %v246_v12 }
 0x14f   : > { %v249_v14 = vmul.f32 1.442695, %v397_v13 }
 0x151   : > { %507 = vpow2.f32 %v249_v14 }
 0x157   : > { %v508_v15 = vpop.eup %507 }
 0x158   : > { %v251_v16 = vadd.f32 1.0, %v508_v15 }
 0x15a   : > { %509 = vrcp.f32 %v251_v16  ;;  %v263_v20 = vand.u32 2147483648, %v251_v16  ;;  %v261_v22 = vand.u32 2147483647, %v251_v16  ;;  %vm257_vm4 = vweird.f32 %v251_v16 }
 0x15c   : > { %v264_v24 = vor.u32 1.1754944e-38, %v263_v20  ;;  %vm262_vm6 = vcmp.eq.f32.partialorder %v261_v22, 8.507059e+37 }
 0x160   : > { %v510_v17 = vpop.eup %509 }
 0x161   : > { %v253_v18 = vmul.f32 %v510_v17, %v251_v16  ;;  %vm258_vm3 = vweird.f32 %v510_v17 }
 0x162   : > { %vm259_vm5 = vmor %vm257_vm4, %vm258_vm3 }
 0x163   : > { %v254_v19 = vsub.f32 1.0, %v253_v18 }
 0x165   : > { %v255_v21 = vmul.f32 %v510_v17, %v254_v19 }
 0x167   : > { %v256_v23 = vadd.f32 %v510_v17, %v255_v21 }
 0x169   : > { %v260_v25 = vsel %vm259_vm5, %v510_v17, %v256_v23 }
 0x16a   : > { %v265_v26 = vsel %vm262_vm6, %v264_v24, %v260_v25 }
 0x16b   : > { %v267_v29 = vadd.f32 1.0, %v265_v26 }
 0x16d   : > { %v269_v30 = vmul.f32 %v268_v27, %v267_v29  ;;  %v272_v31 = vmul.f32 %v271_v28, %v267_v29 }
 0x16f   : > { %270 = vst [vmem:[%s798_s22] sm:$0xff] %v269_v30 }
 0x170   : > { %273 = vst.msk [vmem:[%s798_s22 + $0x8] sm:$0xff] %vm217_vm2, %v272_v31 }
 0x171 PF: > { %s403_s15 = sshll.u32 %s651_s16, 4  ;;  %s288_s28 = sshll.u32 %s798_s22, 4  ;;  %s289_s28 = int_to_ptr.vmem [resolvable:$true] %s288_s28 }
 0x172   : > { %s286_s26 = scalar_lea.hbm %s879_s2, %s403_s15  ;;  %s275_s29 = scalar_lea.sflag [#allocation5], %s174_s23 }
 0x173   : > { %s290_s7 = sshll.u32 %s286_s26, 4  ;;  %s561_s16 = scalar_lea.hbm %s879_s2, 32  ;;  %s291_s7 = int_to_ptr.hbm [resolvable:$true] %s290_s7 }
 0x174   : > { %s555_s30 = sshra.s32 %s291_s7, 4  ;;  %s556_s30 = int_to_ptr.hbm [resolvable:$true] %s555_s30 }
 0x175   : > { %s557_s27 = scalar_lea.hbm %s556_s30, 16  ;;  %p562_p0 = scmp.lt.s32.totalorder %s556_s30, %s879_s2 }
 0x176   : > { %p558_p10 = scmp.ne.s32.totalorder %s556_s30, %s557_s27  ;;  %p563_p1 = scmp.lt.s32.totalorder %s561_s16, %s557_s27 }
 0x178   : > { %p559_p11 = pnand %p558_p10, %p763_p12  ;;  %p564_p4 = por %p563_p1, %p562_p0 }
 0x17a   : > { %p560_p13 = pneg %p559_p11 }
 0x17c   : > { %p565_p5 = pnand %p564_p4, %p560_p13 }
 0x17e   : > { %568 = shalt.err (!%p565_p5)
}
 0x17f   : > { %406 = dma.vmem_to_hbm [thread:$0]  (%p763_p12), %s289_s28, 256, %s291_s7, %s275_s29  }
 0x180 PF: > { %p417_p6 = scmp.ge.s32.totalorder %s663_s19, 2  ;;  %s302_s23 = sand.u32 1, %s623_s9  }
 0x181   : > { %s303_s22 = scalar_lea.sflag [#allocation5], %s302_s23 }
 0x182   : > { %p413_p8 = pnand %p417_p6, %p776_p2 }
 0x184   : > { %p414_p3 = pneg %p413_p8 }
 0x186   : > { %618 = dma.done.wait (%p414_p3), %s303_s22, 256  }
 0x187   : > { %620 = vsyncadd (%p414_p3), %s303_s22, 4294967040  ;;  %s18_s19 = sadd.s32 1, %s663_s19   ;;  %s888_s3 = sld [smem:[#allocation9_spill]] }
 0x188   : > { %p15_p9 = scmp.ge.s32.totalorder %s18_s19, 6   ;;  %s889_s20 = sld [smem:[#allocation10_spill]] }
 0x189   : > { %s890_s9 = smov %s627_s10  ;;  %s891_s10 = smov %s631_s11 }
 0x18a   : > { %s892_s11 = smov %s768_s4  ;;  %s893_s12 = smov %s639_s13 }
 0x18b   : > { %s894_s13 = smov %s643_s14  ;;  %s895_s14 = smov %s771_s5 }
 0x18c   : > { %s896_s15 = smov %s655_s17  ;;  %s897_s16 = smov %s659_s18 }
 0x18d   : > { %s898_s17 = smov %s888_s3  ;;  %17 = sbr.rel (!%p15_p9) target bundleno = 9 (0x9), region = 95 }
 0x18e   : > { %s899_s18 = smov %s889_s20 }
 0x192   :  { %309 = vsyncpa [#allocation4], 1 }
 0x193   :  { %311 = vsyncpa [#allocation4 + $0x1], 1 }
 0x194   :  { %312 = vsyncpa [#allocation5], 1 }
 0x195   :  { %314 = vsyncpa [#allocation5 + $0x1], 1 }

</bundles_post_ra>
